<compile_context>
chip_gen: v7x
topology: tpu7x:2x2x1
jax: 0.10.0
libtpu: 0.0.40
codegen_flags: <defaults>
</compile_context>

<pallas_src>
import functools

import jax
import jax.numpy as jnp
from jax import lax
from jax.experimental import pallas as pl
from jax.experimental.pallas import tpu as pltpu

GAMMA = 2            # module default; kernel specializes gamma == 2 to q*q
IGNORE_INDEX = -100


def _focal_loss_kernel(x_ref, t_ref, out_ref, *, n_rows: int, tile_n: int):
    """One row-tile: emit partial (num, den) for the mean reduction."""
    i = pl.program_id(0)

    x = x_ref[...].astype(jnp.float32)        # [T, C]  (upcast bf16 -> f32 here)
    t = t_ref[...]                            # [T, 1]  int32

    # Numerically stable log-softmax pieces (single exp pass over [T, C]).
    m = jnp.max(x, axis=1, keepdims=True)                         # [T, 1]
    z = x - m                                                     # [T, C]
    lse = jnp.log(jnp.sum(jnp.exp(z), axis=1, keepdims=True))     # [T, 1]

    # Select the target-class column of z BEFORE any further transcendental
    # work (one-hot masked sum; no gather on TPU).
    col = lax.broadcasted_iota(jnp.int32, z.shape, 1)             # [T, C]
    z_t = jnp.sum(jnp.where(col == t, z, 0.0), axis=1, keepdims=True)  # [T, 1]

    logpt_t = z_t - lse                                           # [T, 1]
    pt_t = jnp.exp(logpt_t)                                       # [T, 1]
    q = 1.0 - pt_t
    focal_t = (q * q) * logpt_t                                   # gamma == 2

    # Valid rows: not ignore_index and not the padded tail of a partial tile.
    # TODO(synk): out-of-range targets (!= -100, <0 or >=C) are counted as
    # valid with 0 numerator contribution; PyTorch would raise instead.
    row = lax.broadcasted_iota(jnp.int32, t.shape, 0) + i * tile_n
    valid = (t != IGNORE_INDEX) & (row < n_rows)                  # [T, 1]

    num = jnp.sum(jnp.where(valid, -focal_t, 0.0))                # scalar
    den = jnp.sum(jnp.where(valid, 1.0, 0.0))                     # scalar

    # Pack the two partial sums into lane 0 / lane 1 of this block's (1, 128)
    # output slab (distinct block per grid step -> parallel-safe).
    lane = lax.broadcasted_iota(jnp.int32, (1, 128), 1)
    out_ref[0] = jnp.where(lane == 0, num, jnp.where(lane == 1, den, 0.0))


def _pick_tile_n(n: int, c: int, itemsize: int) -> int:
    # Aim at ~2 MiB per input tile; the pipeline double-buffers it, which stays
    # comfortably inside the default scoped VMEM on v5e/v6e/v7x.
    target_bytes = 2 * 1024 * 1024
    t = target_bytes // max(1, c * itemsize)
    t = max(8, min(1024, (t // 8) * 8))
    return n if t >= n else t


def focal_loss(logits, targets, tile_n=None):
    """logits: [N, C] float (f32 or bf16), targets: [N] int -> scalar f32 loss."""
    n, c = logits.shape
    t2d = targets.reshape(n, 1).astype(jnp.int32)

    if tile_n is None:
        tile_n = _pick_tile_n(n, c, logits.dtype.itemsize)
    if tile_n >= n:
        tile_n = n
    else:
        tile_n = max(8, (tile_n // 8) * 8)

    num_blocks = pl.cdiv(n, tile_n)
    kernel = functools.partial(_focal_loss_kernel, n_rows=n, tile_n=tile_n)

    parts = pl.pallas_call(
        kernel,
        out_shape=jax.ShapeDtypeStruct((num_blocks, 1, 128), jnp.float32),
        grid=(num_blocks,),
        in_specs=[
            pl.BlockSpec((tile_n, c), lambda i: (i, 0)),
            pl.BlockSpec((tile_n, 1), lambda i: (i, 0)),
        ],
        out_specs=pl.BlockSpec((1, 1, 128), lambda i: (i, 0, 0)),
        compiler_params=pltpu.CompilerParams(
            dimension_semantics=("parallel",),
            vmem_limit_bytes=32 * 1024 * 1024,
        ),
    )(logits, t2d)

    num = jnp.sum(parts[:, 0, 0])
    den = jnp.sum(parts[:, 0, 1])
    # NaN when every row is ignored, matching F.nll_loss(..., reduction="mean").
    return num / den


def _reference_focal_loss(logits, targets):
    # Pure-JAX reference for a sanity check.
    logits = logits.astype(jnp.float32)
    logpt = jax.nn.log_softmax(logits, axis=1)
    pt = jnp.exp(logpt)
    focal = (1.0 - pt) ** GAMMA * logpt
    sel = jnp.take_along_axis(focal, targets[:, None].clip(0), axis=1)[:, 0]
    valid = targets != IGNORE_INDEX
    return jnp.sum(jnp.where(valid, -sel, 0.0)) / jnp.sum(valid.astype(jnp.float32))


if __name__ == "__main__":
    key = jax.random.PRNGKey(0)
    k1, k2, k3, k4 = jax.random.split(key, 4)

    # Case 1: small single-block problem, f32.
    N1, C1 = 8, 32
    logits1 = jax.random.normal(k1, (N1, C1), dtype=jnp.float32)
    targets1 = jax.random.randint(k2, (N1,), 0, C1, dtype=jnp.int32)
    targets1 = targets1.at[3].set(IGNORE_INDEX)   # exercise ignore_index
    loss1 = focal_loss(logits1, targets1)
    jax.block_until_ready(loss1)
    ref1 = _reference_focal_loss(logits1, targets1)
    assert jnp.allclose(loss1, ref1, atol=1e-5, rtol=1e-5), (loss1, ref1)

    # Case 1b: bf16 logits (upcast happens inside the kernel).
    loss1b = focal_loss(logits1.astype(jnp.bfloat16), targets1)
    jax.block_until_ready(loss1b)
    ref1b = _reference_focal_loss(logits1.astype(jnp.bfloat16), targets1)
    assert jnp.allclose(loss1b, ref1b, atol=1e-3, rtol=1e-3), (loss1b, ref1b)

    # Case 2: multi-block grid with a partial last tile (exercises row masking
    # and the parallel per-block partial reduction).
    N2, C2 = 200, 32
    logits2 = jax.random.normal(k3, (N2, C2), dtype=jnp.float32)
    targets2 = jax.random.randint(k4, (N2,), 0, C2, dtype=jnp.int32)
    targets2 = targets2.at[17].set(IGNORE_INDEX)
    loss2 = focal_loss(logits2, targets2, tile_n=64)
    jax.block_until_ready(loss2)
    ref2 = _reference_focal_loss(logits2, targets2)
    assert jnp.allclose(loss2, ref2, atol=1e-5, rtol=1e-5), (loss2, ref2)

    print("KERNEL_OK")
</pallas_src>

<mosaic_0001>
module attributes {stable_mosaic.version = 11 : i64} {
  func.func @_focal_loss_kernel(%arg0: i32, %arg1: memref<8x32xf32, #tpu.memory_space<vmem>>, %arg2: memref<8x1xi32, #tpu.memory_space<vmem>>, %arg3: memref<1x1x128xf32, #tpu.memory_space<vmem>>) attributes {dimension_semantics = [#tpu.dimension_semantics<parallel>], iteration_bounds = array<i64: 1>, scalar_prefetch = 0 : i64, scratch_operands = 0 : i64, tpu.core_type = #tpu.core_type<tc>, window_params = [{transform_indices = @transform_0, window_bounds = array<i64: 8, 32>}, {transform_indices = @transform_1, window_bounds = array<i64: 8, 1>}, {transform_indices = @transform_2, window_bounds = array<i64: 1, 1, 128>}]} {
    %c0 = arith.constant 0 : index
    %c0_0 = arith.constant 0 : index
    %0 = vector.load %arg1[%c0, %c0_0] : memref<8x32xf32, #tpu.memory_space<vmem>>, vector<8x32xf32>
    %c0_1 = arith.constant 0 : index
    %c0_2 = arith.constant 0 : index
    %1 = vector.load %arg2[%c0_1, %c0_2] : memref<8x1xi32, #tpu.memory_space<vmem>>, vector<8x1xi32>
    %cst = arith.constant dense<0xFF800000> : vector<8xf32>
    %2 = vector.multi_reduction <maximumf>, %0, %cst [1] : vector<8x32xf32> to vector<8xf32>
    %3 = vector.shape_cast %2 : vector<8xf32> to vector<8x1xf32>
    %4 = vector.broadcast %3 : vector<8x1xf32> to vector<8x32xf32>
    %5 = arith.subf %0, %4 : vector<8x32xf32>
    %6 = math.exp %5 : vector<8x32xf32>
    %cst_3 = arith.constant dense<0.000000e+00> : vector<8xf32>
    %7 = vector.multi_reduction <add>, %6, %cst_3 [1] : vector<8x32xf32> to vector<8xf32>
    %8 = vector.shape_cast %7 : vector<8xf32> to vector<8x1xf32>
    %9 = math.log %8 : vector<8x1xf32>
    %10 = tpu.iota {dimensions = array<i32: 1>} : vector<8x32xi32>
    %11 = vector.broadcast %1 : vector<8x1xi32> to vector<8x32xi32>
    %12 = arith.cmpi eq, %10, %11 : vector<8x32xi32>
    %cst_4 = arith.constant 0.000000e+00 : f32
    %13 = vector.broadcast %cst_4 : f32 to vector<8x32xf32>
    %14 = arith.select %12, %5, %13 : vector<8x32xi1>, vector<8x32xf32>
    %cst_5 = arith.constant dense<0.000000e+00> : vector<8xf32>
    %15 = vector.multi_reduction <add>, %14, %cst_5 [1] : vector<8x32xf32> to vector<8xf32>
    %16 = vector.shape_cast %15 : vector<8xf32> to vector<8x1xf32>
    %17 = arith.subf %16, %9 : vector<8x1xf32>
    %18 = math.exp %17 : vector<8x1xf32>
    %cst_6 = arith.constant 1.000000e+00 : f32
    %19 = vector.broadcast %cst_6 : f32 to vector<8x1xf32>
    %20 = arith.subf %19, %18 : vector<8x1xf32>
    %21 = arith.mulf %20, %20 : vector<8x1xf32>
    %22 = arith.mulf %21, %17 : vector<8x1xf32>
    %23 = tpu.iota {dimensions = array<i32: 0>} : vector<8x1xi32>
    %c8_i32 = arith.constant 8 : i32
    %24 = arith.muli %arg0, %c8_i32 : i32
    %25 = vector.broadcast %24 : i32 to vector<8x1xi32>
    %26 = arith.addi %23, %25 : vector<8x1xi32>
    %c-100_i32 = arith.constant -100 : i32
    %27 = vector.broadcast %c-100_i32 : i32 to vector<8x1xi32>
    %28 = arith.cmpi ne, %1, %27 : vector<8x1xi32>
    %c8_i32_7 = arith.constant 8 : i32
    %29 = vector.broadcast %c8_i32_7 : i32 to vector<8x1xi32>
    %30 = arith.cmpi slt, %26, %29 : vector<8x1xi32>
    %31 = arith.andi %28, %30 : vector<8x1xi1>
    %cst_8 = arith.constant 0.000000e+00 : f32
    %32 = vector.broadcast %cst_8 : f32 to vector<8x1xf32>
    %33 = arith.subf %32, %22 : vector<8x1xf32>
    %cst_9 = arith.constant 0.000000e+00 : f32
    %34 = vector.broadcast %cst_9 : f32 to vector<8x1xf32>
    %35 = arith.select %31, %33, %34 : vector<8x1xi1>, vector<8x1xf32>
    %36 = vector.shape_cast %35 : vector<8x1xf32> to vector<1x8x1xf32>
    %cst_10 = arith.constant dense<0.000000e+00> : vector<1xf32>
    %37 = vector.multi_reduction <add>, %36, %cst_10 [1, 2] : vector<1x8x1xf32> to vector<1xf32>
    %38 = vector.shape_cast %37 : vector<1xf32> to vector<1x1x1xf32>
    %39 = vector.extract %38[0, 0, 0] : f32 from vector<1x1x1xf32>
    %cst_11 = arith.constant 1.000000e+00 : f32
    %cst_12 = arith.constant 0.000000e+00 : f32
    %40 = vector.broadcast %cst_11 : f32 to vector<8x1xf32>
    %41 = vector.broadcast %cst_12 : f32 to vector<8x1xf32>
    %42 = arith.select %31, %40, %41 : vector<8x1xi1>, vector<8x1xf32>
    %43 = vector.shape_cast %42 : vector<8x1xf32> to vector<1x8x1xf32>
    %cst_13 = arith.constant dense<0.000000e+00> : vector<1xf32>
    %44 = vector.multi_reduction <add>, %43, %cst_13 [1, 2] : vector<1x8x1xf32> to vector<1xf32>
    %45 = vector.shape_cast %44 : vector<1xf32> to vector<1x1x1xf32>
    %46 = vector.extract %45[0, 0, 0] : f32 from vector<1x1x1xf32>
    %47 = tpu.iota {dimensions = array<i32: 1>} : vector<1x128xi32>
    %c0_i32 = arith.constant 0 : i32
    %48 = vector.broadcast %c0_i32 : i32 to vector<1x128xi32>
    %49 = arith.cmpi eq, %47, %48 : vector<1x128xi32>
    %c1_i32 = arith.constant 1 : i32
    %50 = vector.broadcast %c1_i32 : i32 to vector<1x128xi32>
    %51 = arith.cmpi eq, %47, %50 : vector<1x128xi32>
    %cst_14 = arith.constant 0.000000e+00 : f32
    %52 = vector.broadcast %46 : f32 to vector<1x128xf32>
    %53 = vector.broadcast %cst_14 : f32 to vector<1x128xf32>
    %54 = arith.select %51, %52, %53 : vector<1x128xi1>, vector<1x128xf32>
    %55 = vector.broadcast %39 : f32 to vector<1x128xf32>
    %56 = arith.select %49, %55, %54 : vector<1x128xi1>, vector<1x128xf32>
    %c0_15 = arith.constant 0 : index
    %c0_16 = arith.constant 0 : index
    %c0_17 = arith.constant 0 : index
    %57 = vector.load %arg3[%c0_15, %c0_16, %c0_17] : memref<1x1x128xf32, #tpu.memory_space<vmem>>, vector<1x1x128xf32>
    %58 = vector.shape_cast %57 : vector<1x1x128xf32> to vector<1x128xf32>
    %59 = vector.shape_cast %56 : vector<1x128xf32> to vector<1x1x128xf32>
    tpu.vector_store %arg3[%c0_15, %c0_16, %c0_17], %59 {strides = array<i32>} : memref<1x1x128xf32, #tpu.memory_space<vmem>>, vector<1x1x128xf32>,
    return
  }
  func.func @transform_0(%arg0: i32) -> (i32, i32) {
    %c0_i32 = arith.constant 0 : i32
    %c0_i32_0 = arith.constant 0 : i32
    return %arg0, %c0_i32 : i32, i32
  }
  func.func @transform_1(%arg0: i32) -> (i32, i32) {
    %c0_i32 = arith.constant 0 : i32
    %c0_i32_0 = arith.constant 0 : i32
    return %arg0, %c0_i32 : i32, i32
  }
  func.func @transform_2(%arg0: i32) -> (i32, i32, i32) {
    %c0_i32 = arith.constant 0 : i32
    %c0_i32_0 = arith.constant 0 : i32
    %c0_i32_1 = arith.constant 0 : i32
    return %arg0, %c0_i32, %c0_i32_0 : i32, i32, i32
  }
}

</mosaic_0001>

<bundles_post_ra>
// kernel: tpu_custom_call.1
= control target key start
LH: loop header
LB: loop body
LE: loop exit
PB: predicated region body
PF: predicated region fallthrough
CT: control target
= control target key end

     0   :  { %vm14_vm0 = vcmask 261120   ;;  %s172_s0 = inlined_call_operand.vmem [shape: f32[8,32], index: 0, kind: input, shape index: {}]   ;;  %s173_s1 = inlined_call_operand.vmem [shape: s32[8,1], index: 1, kind: input, shape index: {}]   ;;  %s174_s2 = inlined_call_operand.hbm [shape: f32[1,1,128], index: 2, kind: output, shape index: {}]  }
   0x1   :  { %v12_v0 = vld [vmem:[%s172_s0] sm:$0xff] }
   0x2   :  { %7 = vsyncpa [#allocation3], 0  ;;  %v15_v1 = vsel %vm14_vm0, %v12_v0, -inf  ;;  %v133_v2 = vmov 0   ;;  %v13_v3 = vld [vmem:[%s173_s1] sm:$0xff]  ;;  %v26_v7 = vlaneseq  ;;  %vm52_vm3 = vcmask 7168  }
   0x3   :  { %102 = vset.pattern.permute.xlu0 %v133_v2  ;;  %vm47_vm2 = vcmp.ne.s32.totalorder %v13_v3, 4294967196  ;;  %v134_v26 = vmov 0.0   ;;  %s135_s1 = smov [#allocation2]  }
   0x4   :  { %16 = vmax.xlane.f32.xlu0 %v15_v1  ;;  %v27_v8 = vand.u32 127, %v26_v7  ;;  %v63_v27 = vsel %vm47_vm2, 1.0, %v134_v26  ;;  %s87_s13 = sshll.u32 %s135_s1, 4  ;;  %s88_s13 = int_to_ptr.vmem [resolvable:$true] %s87_s13 }
   0x5   :  { %v64_v29 = vsel %vm52_vm3, %v63_v27, 0.0  ;;  %s109_s15 = scalar_lea.vmem %s88_s13, 16  ;;  %s113_s16 = scalar_lea.vmem %s88_s13, 32 }
   0x6   :  { %vm75_vm4 = vcmp.eq.s32.totalorder %v27_v8, 1  ;;  %vm74_vm5 = vcmp.eq.s32.totalorder %v27_v8, 0  ;;  %p110_p0 = scmp.ne.s32.totalorder %s88_s13, %s109_s15  ;;  %p114_p1 = scmp.lt.s32.totalorder %s88_s13, %s88_s13 }
   0x7   :  { %p115_p2 = scmp.lt.s32.totalorder %s113_s16, %s109_s15 }
   0x9   :  { %p116_p3 = por %p115_p2, %p114_p1 }
   0xb   :  { %p117_p4 = pnand %p116_p3, %p110_p0 }
  0x1a   :  { %29 = vperm.xlu0 %102, %v13_v3  }
  0x91   :  { %v17_v4 = vpop.xlane.xlu0 %16 }
  0x92   :  { %v18_v5 = vsub.f32 %v12_v0, %v17_v4 }
  0x94   :  { %v19_v6 = vmul.f32 1.442695, %v18_v5 }
  0x96   :  { %103 = vpow2.f32 %v19_v6 }
  0x99   :  { %v30_v9 = vpop.permute.xlu0 %29 }
  0x9a   :  { %vm31_vm1 = vcmp.eq.s32.totalorder %v27_v8, %v30_v9 }
  0x9b   :  { %v32_v12 = vsel %vm31_vm1, %v18_v5, 0.0 }
  0x9c   :  { %v33_v13 = vsel %vm14_vm0, %v32_v12, 0.0 }
  0xa0   :  { %v104_v10 = vpop.eup %103 }
  0xa1   :  { %v21_v11 = vsel %vm14_vm0, %v104_v10, 0.0 }
  0xa2   :  { %22 = vadd.xlane.f32.xlu1 %v21_v11 }
  0xa6   :  { %34 = vadd.xlane.f32.xlu1 %v33_v13 }
 0x12f   :  { %v23_v14 = vpop.xlane.xlu1 %22 }
 0x130   :  { %105 = vlog2.f32 %v23_v14 }
 0x133   :  { %v35_v17 = vpop.xlane.xlu1 %34 }
 0x13a   :  { %v106_v15 = vpop.eup %105 }
 0x13b   :  { %v25_v16 = vmul.f32 0.6931472, %v106_v15 }
 0x13d   :  { %v36_v18 = vsub.f32 %v35_v17, %v25_v16 }
 0x13f   :  { %v37_v19 = vmul.f32 1.442695, %v36_v18 }
 0x141   :  { %107 = vpow2.f32 %v37_v19 }
 0x14b   :  { %v108_v20 = vpop.eup %107 }
 0x14c   :  { %v39_v21 = vsub.f32 1.0, %v108_v20 }
 0x14e   :  { %v40_v22 = vmul.f32 %v39_v21, %v39_v21 }
 0x150   :  { %v41_v23 = vmul.f32 %v40_v22, %v36_v18 }
 0x152   :  { %v50_v24 = vsub.f32 0.0, %v41_v23 }
 0x154   :  { %v51_v25 = vsel %vm47_vm2, %v50_v24, 0.0 }
 0x155   :  { %v53_v28 = vsel %vm52_vm3, %v51_v25, 0.0 }
 0x156   :  { %54 = vadd.xlane.f32.xlu1 %v53_v28 }
 0x15a   :  { %65 = vadd.xlane.f32.xlu1 %v64_v29 }
 0x1e3   :  { %v55_v30 = vpop.xlane.xlu1 %54 }
 0x1e4   :  { %v56_v31 = vrot.slane %v55_v30, 4 }
 0x1e6   :  { %v57_v32 = vadd.f32 %v56_v31, %v55_v30 }
 0x1e7   :  { %v66_v33 = vpop.xlane.xlu1 %65 }
 0x1e8   :  { %v58_v34 = vrot.slane %v57_v32, 2  ;;  %v67_v35 = vrot.slane %v66_v33, 4 }
 0x1ea   :  { %v68_v36 = vadd.f32 %v67_v35, %v66_v33  ;;  %v59_v37 = vadd.f32 %v58_v34, %v57_v32 }
 0x1ec   :  { %v69_v38 = vrot.slane %v68_v36, 2  ;;  %v60_v39 = vrot.slane %v59_v37, 1 }
 0x1ee   :  { %v70_v40 = vadd.f32 %v69_v38, %v68_v36  ;;  %v61_v41 = vadd.f32 %v60_v39, %v59_v37 }
 0x1f0   :  { %95 = vpush %v61_v41  ;;  %v71_v42 = vrot.slane %v70_v40, 1 }
 0x1f2   :  { %v72_v43 = vadd.f32 %v71_v42, %v70_v40 }
 0x1f4   :  { %97 = vpush %v72_v43 }
 0x221   :  { %s96_s0 = spop %95 }
 0x222   :  { %v78_v45 = vstv %s96_s0 }
 0x225   :  { %s98_s14 = spop %97 }
 0x226   :  { %v76_v44 = vstv %s98_s14 }
 0x227   :  { %v77_v46 = vsel %vm75_vm4, %v76_v44, 0.0 }
 0x228   :  { %v79_v47 = vsel %vm74_vm5, %v78_v45, %v77_v46 }
 0x229   :  { %80 = vst [vmem:[#allocation2] sm:$0x1] %v79_v47 }
 0x22a   :  { %120 = shalt.err (!%p117_p4)
}
 0x22b   :  { %s121_s19 = scalar_lea.hbm %s174_s2, 16 }
 0x22c   :  { %p122_p5 = scmp.ne.s32.totalorder %s174_s2, %s121_s19  ;;  %p125_p6 = scmp.lt.u32.totalorder %s121_s19, %s174_s2 }
 0x22e   :  { %p127_p7 = pnand %p125_p6, %p122_p5 }
 0x230   :  { %130 = shalt.err (!%p127_p7)
}
 0x231   :  { %90 = dma.vmem_to_hbm [thread:$0]  %s88_s13, 16, %s174_s2, [#allocation3]  }
 0x232   :  { %131 = dma.done.wait [#allocation3], 16  }
 0x233   :  { %132 = vsyncadd [#allocation3], 4294967280 }
 0x234   :  { %94 = vsyncpa [#allocation3], 1 }

</bundles_post_ra>
